<compile_context>
chip_gen: v6e
topology: v6e:2x2x1
jax: 0.10.0
libtpu: 0.0.40
codegen_flags: <defaults>
</compile_context>

<pallas_src>
import functools
import math

import jax
import jax.numpy as jnp
from jax.experimental import pallas as pl
from jax.experimental.pallas import tpu as pltpu


def _round_up(x, m):
    return ((x + m - 1) // m) * m


def _vmem_capacity_bytes():
    try:
        return int(pltpu.get_tpu_info().vmem_capacity_bytes)
    except Exception:
        return 64 * 1024 * 1024  # conservative (v7x-sized) fallback


def _choose_tm(M, tm_target):
    """Row tile: 8-aligned, >=2 tiles when possible (v7x megacore), low pad waste."""
    M8 = _round_up(max(M, 1), 8)
    tgt = max(128, _round_up(tm_target, 128))
    if M8 < 16:
        tm = M8
    elif M8 <= 2 * tgt:
        # split into two row tiles so a second TensorCore is not idle
        tm = _round_up(-(-M8 // 2), 8 if M8 <= 256 else 128)
    else:
        n = -(-M8 // tgt)
        tm = _round_up(-(-M8 // n), 128)
    return tm, _round_up(M8, tm)


def _pad2d(a, shape, dtype):
    """Pad/cast to (shape, dtype); a no-op in the jitted graph if already there."""
    if a.shape == shape and a.dtype == dtype:
        return a
    if a.shape == shape:
        return a.astype(dtype)
    return jnp.zeros(shape, dtype).at[:a.shape[0], :a.shape[1]].set(a.astype(dtype))


# ----------------------------- kernels ---------------------------------------

def _ffn_resident_kernel(x_ref, w1_ref, b1_ref, w2_ref, b2_ref, o_ref, *,
                         approximate):
    # x:(tm,dim_p) bf16   w1:(dim_p,hid_p) bf16   b1:(1,hid_p) f32
    # w2:(hid_p,dim_p) bf16   b2:(1,dim_p) f32   o:(tm,dim_p)
    pre = jnp.dot(x_ref[...], w1_ref[...],
                  preferred_element_type=jnp.float32) + b1_ref[...]
    act = jax.nn.gelu(pre, approximate=approximate)
    # Dropout (p=0.1) is identity in eval mode.
    out = jnp.dot(act.astype(w2_ref.dtype), w2_ref[...],
                  preferred_element_type=jnp.float32) + b2_ref[...]
    o_ref[...] = out.astype(o_ref.dtype)


def _ffn_streamed_kernel(x_ref, w1_ref, b1_ref, w2_ref, b2_ref, o_ref, acc_ref,
                         *, approximate):
    # Streams W1/W2 in hidden chunks; acc_ref persists across the hidden axis.
    h = pl.program_id(1)

    @pl.when(h == 0)
    def _():
        # Fold b2 into the accumulator init (saves a full-tile add + store later).
        acc_ref[...] = jnp.broadcast_to(b2_ref[...], acc_ref.shape)

    pre = jnp.dot(x_ref[...], w1_ref[...],
                  preferred_element_type=jnp.float32) + b1_ref[...]
    act = jax.nn.gelu(pre, approximate=approximate)
    # Dropout (p=0.1) is identity in eval mode.
    acc_ref[...] += jnp.dot(act.astype(w2_ref.dtype), w2_ref[...],
                            preferred_element_type=jnp.float32)

    @pl.when(h == pl.num_programs(1) - 1)
    def _():
        o_ref[...] = acc_ref[...].astype(o_ref.dtype)


# ----------------------------- wrapper ----------------------------------------

def prepare_ffn_params(w1, b1, w2, b2, *, compute_dtype=jnp.bfloat16):
    """One-time pad (to multiples of 128) + cast of the FFN parameters.

    Doing this once outside the per-call jit removes the per-forward weight
    pad/cast HBM copies; feed_forward accepts either raw or prepared params.
    """
    w1 = jnp.asarray(w1)
    w2 = jnp.asarray(w2)
    dim, hidden = w1.shape
    dim_p = _round_up(dim, 128)
    hidden_p = _round_up(hidden, 128)
    w1_p = _pad2d(w1, (dim_p, hidden_p), compute_dtype)
    w2_p = _pad2d(w2, (hidden_p, dim_p), compute_dtype)
    b1_p = _pad2d(jnp.asarray(b1).reshape(1, -1), (1, hidden_p), jnp.float32)
    b2_p = _pad2d(jnp.asarray(b2).reshape(1, -1), (1, dim_p), jnp.float32)
    return w1_p, b1_p, w2_p, b2_p


@functools.partial(
    jax.jit,
    static_argnames=("tm", "th", "approximate_gelu", "compute_dtype",
                     "force_streamed"))
def feed_forward(x, w1, b1, w2, b2, *, tm=512, th=512, approximate_gelu=True,
                 compute_dtype=jnp.bfloat16, force_streamed=False):
    """x: [..., dim] -> [..., dim].  w1: [dim(_p), hidden(_p)], w2: [hidden(_p), dim(_p)].

    Weights may be passed raw or pre-padded/cast via prepare_ffn_params (in
    which case no per-call weight copies are emitted inside the jit).
    """
    *lead, dim = x.shape
    M = int(math.prod(lead)) if lead else 1
    out_dtype = x.dtype
    csize = jnp.dtype(compute_dtype).itemsize
    osize = jnp.dtype(out_dtype).itemsize

    dim_p = _round_up(dim, 128)
    hidden = w1.shape[1]                      # may already be 128-padded
    hidden_p = _round_up(hidden, 128)
    tm_eff, M_p = _choose_tm(M, tm)

    vmem_cap = _vmem_capacity_bytes()

    # ---- resident-weight fast path? ------------------------------------------
    resident_bytes = (
        2 * tm_eff * dim_p * csize                # x tile (double-buffered)
        + 2 * tm_eff * dim_p * osize              # out tile
        + 2 * 2 * dim_p * hidden_p * csize        # W1 + W2 (worst case 2-buffered)
        + 2 * 8 * (hidden_p + dim_p) * 4          # biases (sublane-padded)
        + tm_eff * hidden_p * (4 + csize)         # pre (f32) + act (bf16)
        + tm_eff * dim_p * 4                      # f32 epilogue slab
    )
    use_resident = (not force_streamed) and resident_bytes <= int(0.70 * vmem_cap)

    if use_resident:
        hidden_pp = hidden_p
    else:
        th_eff = max(128, min(_round_up(th, 128), hidden_p))
        hidden_pp = _round_up(hidden_p, th_eff)   # pad hidden so chunks stay large

    # ---- pad / cast (no-ops in the graph when already prepared) ---------------
    x_p = _pad2d(x.reshape(M, dim), (M_p, dim_p), compute_dtype)
    w1_p = _pad2d(jnp.asarray(w1), (dim_p, hidden_pp), compute_dtype)
    w2_p = _pad2d(jnp.asarray(w2), (hidden_pp, dim_p), compute_dtype)
    b1_p = _pad2d(jnp.asarray(b1).reshape(1, -1), (1, hidden_pp), jnp.float32)
    b2_p = _pad2d(jnp.asarray(b2).reshape(1, -1), (1, dim_p), jnp.float32)

    if use_resident:
        vmem_limit = int(min(max(int(1.25 * resident_bytes), 32 * 1024 * 1024),
                             int(0.75 * vmem_cap)))
        kernel = functools.partial(_ffn_resident_kernel,
                                   approximate=approximate_gelu)
        out_p = pl.pallas_call(
            kernel,
            out_shape=jax.ShapeDtypeStruct((M_p, dim_p), out_dtype),
            grid_spec=pltpu.PrefetchScalarGridSpec(
                num_scalar_prefetch=0,
                grid=(M_p // tm_eff,),
                in_specs=[
                    pl.BlockSpec((tm_eff, dim_p), lambda i: (i, 0)),     # x rows
                    pl.BlockSpec((dim_p, hidden_pp), lambda i: (0, 0)),  # W1 (resident)
                    pl.BlockSpec((1, hidden_pp), lambda i: (0, 0)),      # b1 (resident)
                    pl.BlockSpec((hidden_pp, dim_p), lambda i: (0, 0)),  # W2 (resident)
                    pl.BlockSpec((1, dim_p), lambda i: (0, 0)),          # b2 (resident)
                ],
                out_specs=pl.BlockSpec((tm_eff, dim_p), lambda i: (i, 0)),
            ),
            compiler_params=pltpu.CompilerParams(
                dimension_semantics=("parallel",),
                vmem_limit_bytes=vmem_limit,
            ),
        )(x_p, w1_p, b1_p, w2_p, b2_p)
    else:
        streamed_bytes = (
            2 * tm_eff * dim_p * csize                          # x tile
            + 2 * (dim_p * th_eff + th_eff * dim_p) * csize     # W1/W2 chunks
            + 2 * tm_eff * dim_p * osize                        # out tile
            + tm_eff * dim_p * 4                                # f32 accumulator
            + tm_eff * th_eff * (4 + csize)                     # pre + act slabs
            + 2 * 8 * (th_eff + dim_p) * 4                      # biases
        )
        vmem_limit = int(min(max(int(1.25 * streamed_bytes), 32 * 1024 * 1024),
                             int(0.75 * vmem_cap)))
        kernel = functools.partial(_ffn_streamed_kernel,
                                   approximate=approximate_gelu)
        out_p = pl.pallas_call(
            kernel,
            out_shape=jax.ShapeDtypeStruct((M_p, dim_p), out_dtype),
            grid_spec=pltpu.PrefetchScalarGridSpec(
                num_scalar_prefetch=0,
                grid=(M_p // tm_eff, hidden_pp // th_eff),
                in_specs=[
                    pl.BlockSpec((tm_eff, dim_p), lambda i, h: (i, 0)),  # x rows
                    pl.BlockSpec((dim_p, th_eff), lambda i, h: (0, h)),  # W1 chunk
                    pl.BlockSpec((1, th_eff), lambda i, h: (0, h)),      # b1 chunk
                    pl.BlockSpec((th_eff, dim_p), lambda i, h: (h, 0)),  # W2 chunk
                    pl.BlockSpec((1, dim_p), lambda i, h: (0, 0)),       # b2
                ],
                out_specs=pl.BlockSpec((tm_eff, dim_p), lambda i, h: (i, 0)),
                scratch_shapes=[pltpu.VMEM((tm_eff, dim_p), jnp.float32)],
            ),
            compiler_params=pltpu.CompilerParams(
                dimension_semantics=("parallel", "arbitrary"),
                vmem_limit_bytes=vmem_limit,
            ),
        )(x_p, w1_p, b1_p, w2_p, b2_p)

    return out_p[:M, :dim].reshape(*lead, dim)


def init_params(key, dim, hidden_dim, dtype=jnp.float32):
    """Deterministic init mirroring nn.Linear's uniform(-1/sqrt(fan_in), 1/sqrt(fan_in))."""
    k1, k2, k3, k4 = jax.random.split(key, 4)
    bound1 = 1.0 / (dim ** 0.5)
    bound2 = 1.0 / (hidden_dim ** 0.5)
    w1 = jax.random.uniform(k1, (dim, hidden_dim), dtype, -bound1, bound1)
    b1 = jax.random.uniform(k2, (1, hidden_dim), dtype, -bound1, bound1)
    w2 = jax.random.uniform(k3, (hidden_dim, dim), dtype, -bound2, bound2)
    b2 = jax.random.uniform(k4, (1, dim), dtype, -bound2, bound2)
    return w1, b1, w2, b2


if __name__ == "__main__":
    key = jax.random.PRNGKey(0)

    # Matmul-input quantization used by both kernel and reference (bf16 MXU, f32 acc).
    q = lambda a: a.astype(jnp.bfloat16).astype(jnp.float32)

    # ---- Test 1: resident-weight path, compared against PyTorch semantics
    # (exact-erf GELU, eval-mode dropout = identity). ---------------------------
    B, N, dim, hidden_dim = 2, 8, 32, 64
    kx, kp, kx2, kp2 = jax.random.split(key, 4)
    x = jax.random.normal(kx, (B, N, dim), jnp.float32)
    w1, b1, w2, b2 = init_params(kp, dim, hidden_dim)

    # Pre-pad / pre-cast weights once, outside the per-call jit.
    w1_p, b1_p, w2_p, b2_p = prepare_ffn_params(w1, b1, w2, b2)

    out = feed_forward(x, w1_p, b1_p, w2_p, b2_p)
    out = jax.block_until_ready(out)

    h_ref = jax.nn.gelu(q(x) @ q(w1) + b1.reshape(-1), approximate=False)
    ref = q(h_ref) @ q(w2) + b2.reshape(-1)
    assert out.shape == (B, N, dim)
    assert jnp.allclose(out, ref, atol=2e-2, rtol=2e-2), \
        float(jnp.max(jnp.abs(out - ref)))

    # ---- Test 2: streamed-weight path (forced), multi-chunk hidden reduction. --
    B2, N2, dim2, hidden2 = 2, 64, 256, 1024
    x2 = jax.random.normal(kx2, (B2, N2, dim2), jnp.float32)
    w1b, b1b, w2b, b2b = init_params(kp2, dim2, hidden2)

    out2 = feed_forward(x2, w1b, b1b, w2b, b2b, th=256, force_streamed=True)
    out2 = jax.block_until_ready(out2)

    h2 = jax.nn.gelu(q(x2) @ q(w1b) + b1b.reshape(-1), approximate=True)
    ref2 = q(h2) @ q(w2b) + b2b.reshape(-1)
    assert out2.shape == (B2, N2, dim2)
    assert jnp.allclose(out2, ref2, atol=2e-2, rtol=2e-2), \
        float(jnp.max(jnp.abs(out2 - ref2)))

    print("KERNEL_OK")
</pallas_src>

<mosaic_0001>
module attributes {stable_mosaic.version = 11 : i64} {
  func.func @_ffn_resident_kernel(%arg0: i32, %arg1: memref<8x128xbf16, #tpu.memory_space<vmem>>, %arg2: memref<128x128xbf16, #tpu.memory_space<vmem>>, %arg3: memref<1x128xf32, #tpu.memory_space<vmem>>, %arg4: memref<128x128xbf16, #tpu.memory_space<vmem>>, %arg5: memref<1x128xf32, #tpu.memory_space<vmem>>, %arg6: memref<8x128xf32, #tpu.memory_space<vmem>>) attributes {dimension_semantics = [#tpu.dimension_semantics<parallel>], iteration_bounds = array<i64: 2>, scalar_prefetch = 0 : i64, scratch_operands = 0 : i64, tpu.core_type = #tpu.core_type<tc>, window_params = [{transform_indices = @transform_0, window_bounds = array<i64: 8, 128>}, {pipeline_mode = #tpu.pipeline_mode<synchronous>, transform_indices = @transform_1, window_bounds = array<i64: 128, 128>}, {pipeline_mode = #tpu.pipeline_mode<synchronous>, transform_indices = @transform_2, window_bounds = array<i64: 1, 128>}, {pipeline_mode = #tpu.pipeline_mode<synchronous>, transform_indices = @transform_3, window_bounds = array<i64: 128, 128>}, {pipeline_mode = #tpu.pipeline_mode<synchronous>, transform_indices = @transform_4, window_bounds = array<i64: 1, 128>}, {transform_indices = @transform_5, window_bounds = array<i64: 8, 128>}]} {
    %c0 = arith.constant 0 : index
    %c0_0 = arith.constant 0 : index
    %0 = vector.load %arg1[%c0, %c0_0] : memref<8x128xbf16, #tpu.memory_space<vmem>>, vector<8x128xbf16>
    %c0_1 = arith.constant 0 : index
    %c0_2 = arith.constant 0 : index
    %1 = vector.load %arg2[%c0_1, %c0_2] : memref<128x128xbf16, #tpu.memory_space<vmem>>, vector<128x128xbf16>
    %cst = arith.constant dense<0.000000e+00> : vector<8x128xf32>
    %2 = tpu.matmul %0, %1, %cst {dimension_numbers = #tpu.dot_dimension_numbers<[1], [0], [0], [1], [0, 0, 1, 1], [], []>} : vector<8x128xbf16>, vector<128x128xbf16>, vector<8x128xf32> -> vector<8x128xf32>
    %c0_3 = arith.constant 0 : index
    %c0_4 = arith.constant 0 : index
    %3 = vector.load %arg3[%c0_3, %c0_4] : memref<1x128xf32, #tpu.memory_space<vmem>>, vector<1x128xf32>
    %4 = vector.broadcast %3 : vector<1x128xf32> to vector<8x128xf32>
    %5 = arith.addf %2, %4 : vector<8x128xf32>
    %6 = arith.mulf %5, %5 : vector<8x128xf32>
    %7 = arith.mulf %5, %6 : vector<8x128xf32>
    %cst_5 = arith.constant 4.471500e-02 : f32
    %8 = vector.broadcast %cst_5 : f32 to vector<8x128xf32>
    %9 = arith.mulf %8, %7 : vector<8x128xf32>
    %10 = arith.addf %5, %9 : vector<8x128xf32>
    %cst_6 = arith.constant 0.797884583 : f32
    %11 = vector.broadcast %cst_6 : f32 to vector<8x128xf32>
    %12 = arith.mulf %11, %10 : vector<8x128xf32>
    %13 = math.tanh %12 : vector<8x128xf32>
    %cst_7 = arith.constant 1.000000e+00 : f32
    %14 = vector.broadcast %cst_7 : f32 to vector<8x128xf32>
    %15 = arith.addf %14, %13 : vector<8x128xf32>
    %cst_8 = arith.constant 5.000000e-01 : f32
    %16 = vector.broadcast %cst_8 : f32 to vector<8x128xf32>
    %17 = arith.mulf %16, %15 : vector<8x128xf32>
    %18 = arith.mulf %5, %17 : vector<8x128xf32>
    %19 = arith.truncf %18 : vector<8x128xf32> to vector<8x128xbf16>
    %c0_9 = arith.constant 0 : index
    %c0_10 = arith.constant 0 : index
    %20 = vector.load %arg4[%c0_9, %c0_10] : memref<128x128xbf16, #tpu.memory_space<vmem>>, vector<128x128xbf16>
    %cst_11 = arith.constant dense<0.000000e+00> : vector<8x128xf32>
    %21 = tpu.matmul %19, %20, %cst_11 {dimension_numbers = #tpu.dot_dimension_numbers<[1], [0], [0], [1], [0, 0, 1, 1], [], []>} : vector<8x128xbf16>, vector<128x128xbf16>, vector<8x128xf32> -> vector<8x128xf32>
    %c0_12 = arith.constant 0 : index
    %c0_13 = arith.constant 0 : index
    %22 = vector.load %arg5[%c0_12, %c0_13] : memref<1x128xf32, #tpu.memory_space<vmem>>, vector<1x128xf32>
    %23 = vector.broadcast %22 : vector<1x128xf32> to vector<8x128xf32>
    %24 = arith.addf %21, %23 : vector<8x128xf32>
    %c0_14 = arith.constant 0 : index
    %c0_15 = arith.constant 0 : index
    %25 = vector.load %arg6[%c0_14, %c0_15] : memref<8x128xf32, #tpu.memory_space<vmem>>, vector<8x128xf32>
    tpu.vector_store %arg6[%c0_14, %c0_15], %24 {strides = array<i32>} : memref<8x128xf32, #tpu.memory_space<vmem>>, vector<8x128xf32>,
    return
  }
  func.func @transform_0(%arg0: i32) -> (i32, i32) {
    %c0_i32 = arith.constant 0 : i32
    %c0_i32_0 = arith.constant 0 : i32
    return %arg0, %c0_i32 : i32, i32
  }
  func.func @transform_1(%arg0: i32) -> (i32, i32) {
    %c0_i32 = arith.constant 0 : i32
    %c0_i32_0 = arith.constant 0 : i32
    %c0_i32_1 = arith.constant 0 : i32
    return %c0_i32, %c0_i32_0 : i32, i32
  }
  func.func @transform_2(%arg0: i32) -> (i32, i32) {
    %c0_i32 = arith.constant 0 : i32
    %c0_i32_0 = arith.constant 0 : i32
    %c0_i32_1 = arith.constant 0 : i32
    return %c0_i32, %c0_i32_0 : i32, i32
  }
  func.func @transform_3(%arg0: i32) -> (i32, i32) {
    %c0_i32 = arith.constant 0 : i32
    %c0_i32_0 = arith.constant 0 : i32
    %c0_i32_1 = arith.constant 0 : i32
    return %c0_i32, %c0_i32_0 : i32, i32
  }
  func.func @transform_4(%arg0: i32) -> (i32, i32) {
    %c0_i32 = arith.constant 0 : i32
    %c0_i32_0 = arith.constant 0 : i32
    %c0_i32_1 = arith.constant 0 : i32
    return %c0_i32, %c0_i32_0 : i32, i32
  }
  func.func @transform_5(%arg0: i32) -> (i32, i32) {
    %c0_i32 = arith.constant 0 : i32
    %c0_i32_0 = arith.constant 0 : i32
    return %arg0, %c0_i32 : i32, i32
  }
}

</mosaic_0001>

<bundles_post_ra>
// kernel: feed_forward.1
= control target key start
LH: loop header
LB: loop body
LE: loop exit
PB: predicated region body
PF: predicated region fallthrough
CT: control target
= control target key end

     0   :  { %10 = vsyncpa [#allocation3], 0  ;;  %s876_s0 = inlined_call_operand.vmem [shape: bf16[16,128], index: 0, kind: input, shape index: {}]   ;;  %s877_s1 = inlined_call_operand.hbm [shape: bf16[128,128], index: 1, kind: input, shape index: {}]   ;;  %s878_s2 = inlined_call_operand.vmem [shape: f32[1,128], index: 2, kind: input, shape index: {}]   ;;  %s879_s3 = inlined_call_operand.hbm [shape: bf16[128,128], index: 3, kind: input, shape index: {}]   ;;  %s880_s4 = inlined_call_operand.vmem [shape: f32[1,128], index: 4, kind: input, shape index: {}]   ;;  %s881_s5 = inlined_call_operand.vmem [shape: f32[16,128], index: 5, kind: output, shape index: {}]  }
   0x1   :  { %11 = vsyncpa [#allocation5], 0  ;;  %s804_s18 = smov 0  }
   0x2 LB: > { %s810_s19 = sadd.s32 4294967295, %s766_s18   ;;  %p562_p0 = scmp.ge.s32.totalorder %s766_s18, 1  ;;  %s766_s18 = sphi %s804_s18, %s17_s18  }
   0x3   : > { %p158_p1 = scmp.lt.s32.totalorder %s766_s18, 3  ;;  %s768_s20 = smov [#allocation2]  }
   0x4   : > { %s170_s21 = sshll.u32 %s768_s20, 4  ;;  %p664_p3 = scmp.eq.s32.totalorder %s810_s19, 0  ;;  %s171_s21 = int_to_ptr.vmem [resolvable:$true] %s170_s21 }
   0x5   : > { %p814_p2 = pnand %p562_p0, %p158_p1  ;;  %s769_s23 = smov [#allocation4]  }
   0x6   : > { %s186_s24 = sshll.u32 %s769_s23, 4  ;;  %s711_s26 = scalar_lea.vmem %s171_s21, 1024  ;;  %s187_s24 = int_to_ptr.vmem [resolvable:$true] %s186_s24 }
   0x7   : > { %p657_p4 = pneg %p814_p2  ;;  %p712_p7 = scmp.ne.s32.totalorder %s171_s21, %s711_s26 }
   0x8   : > { %p719_p10 = scmp.lt.s32.totalorder %s171_s21, %s171_s21  ;;  %p720_p11 = scmp.lt.s32.totalorder %s711_s26, %s711_s26 }
   0x9   : > { %p823_p5 = pnand %p664_p3, %p657_p4 }
   0xa   : > { %p721_p12 = por %p720_p11, %p719_p10 }
   0xb   : > { %p702_p6 = pneg %p823_p5 }
   0xd   : > { %p714_p8 = pnand %p712_p7, %p702_p6 }
   0xf   : > { %p715_p9 = pneg %p714_p8 }
  0x11   : > { %p722_p13 = pnand %p721_p12, %p715_p9 }
  0x13   : > { %725 = shalt.err (!%p722_p13)
}
  0x14   : > { %s770_s27 = smov 64   ;;  %s771_s28 = smov 4  }
  0x15   : > { %660 = dma.hbm_to_vmem [thread:$0]  (!%p823_p5), %s877_s1, 1024, %s171_s21, [#allocation3], %s770_s27, %s770_s27, %s771_s28  }
  0x16   : > { %s737_s6 = scalar_lea.vmem %s187_s24, 1024  ;;  %p745_p7 = scmp.lt.s32.totalorder %s187_s24, %s187_s24 }
  0x17   : > { %p738_p0 = scmp.ne.s32.totalorder %s187_s24, %s737_s6  ;;  %p746_p8 = scmp.lt.s32.totalorder %s737_s6, %s737_s6 }
  0x19   : > { %p740_p1 = pnand %p738_p0, %p702_p6  ;;  %p747_p10 = por %p746_p8, %p745_p7 }
  0x1b   : > { %p741_p4 = pneg %p740_p1 }
  0x1d   : > { %p748_p9 = pnand %p747_p10, %p741_p4 }
  0x1f   : > { %751 = shalt.err (!%p748_p9)
}
  0x20   : > { %663 = dma.hbm_to_vmem [thread:$0]  (!%p823_p5), %s879_s3, 1024, %s187_s24, [#allocation5], %s770_s27, %s770_s27, %s771_s28  }
  0x21   : > { %212 = sbr.rel (%p814_p2) target bundleno = 501 (0x1f5), region = 40 }
  0x26   : > { %757 = dma.done.wait (%p664_p3), [#allocation3], 1024  }
  0x27   : > { %759 = vsyncadd (%p664_p3), [#allocation3], 4294966272 }
  0x28   : > { %761 = dma.done.wait (%p664_p3), [#allocation5], 1024  }
  0x29   : > { %763 = vsyncadd (%p664_p3), [#allocation5], 4294966272  ;;  %v772_v0 = vmov 0.0   ;;  %vm773_vm0 = vmmov 0   ;;  %v682_v1 = vld [vmem:[#allocation2 + $0x38] sm:$0xff]   ;;  %v683_v2 = vld [vmem:[#allocation2 + $0x30] sm:$0xff]  }
  0x2a   : > { %609 = vmatprep.subr.bf16.mxu0 %v772_v0  ;;  %625 = vmatprep.mubr.msk.bf16.mxu0 %vm773_vm0, %v772_v0  ;;  %v684_v3 = vld [vmem:[#allocation2 + $0x28] sm:$0xff]   ;;  %v685_v4 = vld [vmem:[#allocation2 + $0x20] sm:$0xff]   ;;  %v686_v5 = vld [vmem:[#allocation2 + $0x18] sm:$0xff]   ;;  %p242_p2 = scmp.lt.s32.totalorder %s810_s19, 1 }
  0x2b   : > { %629 = vmatprep.subr.bf16.mxu1 %v772_v0  ;;  %645 = vmatprep.mubr.msk.bf16.mxu1 %vm773_vm0, %v772_v0  ;;  %v687_v6 = vld [vmem:[#allocation2 + $0x10] sm:$0xff]   ;;  %v688_v7 = vld [vmem:[#allocation2 + $0x8] sm:$0xff]   ;;  %v689_v8 = vld [vmem:[#allocation2] sm:$0xff]  }
  0x2c   : > { %610 = vmatpush3.bf16.msra.mxu0 %v682_v1  ;;  %s885_s19 = smov (!%p242_p2, %s810_s19), 1  ;;  %v690_v10 = vld [vmem:[#allocation4 + $0x38] sm:$0xff]   ;;  %v691_v11 = vld [vmem:[#allocation4 + $0x30] sm:$0xff]   ;;  %v692_v12 = vld [vmem:[#allocation4 + $0x28] sm:$0xff]  }
  0x2d   : > { %611 = vmatprep.subr.bf16.mxu0 %v772_v0  ;;  %s569_s9 = sshll.u32 %s885_s19, 2  ;;  %630 = vmatpush3.bf16.msra.mxu1 %v690_v10  ;;  %v693_v13 = vld [vmem:[#allocation4 + $0x20] sm:$0xff]   ;;  %v694_v14 = vld [vmem:[#allocation4 + $0x18] sm:$0xff]   ;;  %v695_v15 = vld [vmem:[#allocation4 + $0x10] sm:$0xff]   ;;  %s570_s15 = sshll.u32 %s885_s19, 3 }
  0x2e   : > { %s245_s12 = scalar_lea.vmem %s876_s0, %s569_s9  ;;  %631 = vmatprep.subr.bf16.mxu1 %v772_v0  ;;  %v696_v16 = vld [vmem:[#allocation4 + $0x8] sm:$0xff]   ;;  %v697_v17 = vld [vmem:[#allocation4] sm:$0xff]   ;;  %s249_s22 = scalar_lea.vmem %s881_s5, %s570_s15 }
  0x2f   : > { %v251_v9 = vld [vmem:[%s245_s12] sm:$0xf] }
  0x30   : > { %612 = vmatpush3.bf16.msra.mxu0 %v683_v2  ;;  %v571_v18 = vld [vmem:[%s878_s2] ss:$0 sm:$0xff] }
  0x31   : > { %613 = vmatprep.subr.bf16.mxu0 %v772_v0  ;;  %632 = vmatpush3.bf16.msra.mxu1 %v691_v11  ;;  %v580_v34 = vld [vmem:[%s880_s4] ss:$0 sm:$0xff] }
  0x32   : > { %633 = vmatprep.subr.bf16.mxu1 %v772_v0 }
  0x34   : > { %614 = vmatpush3.bf16.msra.mxu0 %v684_v3 }
  0x35   : > { %615 = vmatprep.subr.bf16.mxu0 %v772_v0  ;;  %634 = vmatpush3.bf16.msra.mxu1 %v692_v12 }
  0x36   : > { %635 = vmatprep.subr.bf16.mxu1 %v772_v0 }
  0x38   : > { %616 = vmatpush3.bf16.msra.mxu0 %v685_v4 }
  0x39   : > { %617 = vmatprep.subr.bf16.mxu0 %v772_v0  ;;  %636 = vmatpush3.bf16.msra.mxu1 %v693_v13 }
  0x3a   : > { %637 = vmatprep.subr.bf16.mxu1 %v772_v0 }
  0x3c   : > { %618 = vmatpush3.bf16.msra.mxu0 %v686_v5 }
  0x3d   : > { %619 = vmatprep.subr.bf16.mxu0 %v772_v0  ;;  %638 = vmatpush3.bf16.msra.mxu1 %v694_v14 }
  0x3e   : > { %639 = vmatprep.subr.bf16.mxu1 %v772_v0 }
  0x40   : > { %620 = vmatpush3.bf16.msra.mxu0 %v687_v6 }
  0x41   : > { %621 = vmatprep.subr.bf16.mxu0 %v772_v0  ;;  %640 = vmatpush3.bf16.msra.mxu1 %v695_v15 }
  0x42   : > { %641 = vmatprep.subr.bf16.mxu1 %v772_v0 }
  0x44   : > { %622 = vmatpush3.bf16.msra.mxu0 %v688_v7 }
  0x45   : > { %623 = vmatprep.subr.bf16.mxu0 %v772_v0  ;;  %642 = vmatpush3.bf16.msra.mxu1 %v696_v16 }
  0x46   : > { %643 = vmatprep.subr.bf16.mxu1 %v772_v0 }
  0x48   : > { %624 = vmatpush3.bf16.msra.mxu0 %v689_v8 }
  0x49   : > { %644 = vmatpush3.bf16.msra.mxu1 %v697_v17 }
  0x4b   : > { %626 = vmatmul.mubr.bf16.vlgmr.msra.gmra.mxu0 %v251_v9 }
 0x10b   : > { %v357_v19 = vpop.f32.mrf.mxu0 }
 0x10c   : > { %v358_v20 = vadd.f32 %v571_v18, %v357_v19 }
 0x10d   : > { %v627_v21 = vpop.f32.mrf.mxu0 }
 0x10e   : > { %v363_v22 = vmul.f32 %v358_v20, %v358_v20 }
 0x10f   : > { %v360_v23 = vpop.f32.mrf.mxu0 }
 0x110   : > { %v364_v24 = vmul.f32 %v363_v22, %v358_v20 }
 0x111   : > { %v628_v25 = vpop.f32.mrf.mxu0 }
 0x112   : > { %v365_v26 = vmul.f32 0.044715, %v364_v24 }
 0x114   : > { %v366_v27 = vadd.f32 %v365_v26, %v358_v20 }
 0x116   : > { %v367_v28 = vmul.f32 0.7978846, %v366_v27 }
 0x118   : > { %698 = vtanh.f32 %v367_v28 }
 0x125   : > { %v699_v29 = vpop.eup %698 }
 0x126   : > { %v369_v30 = vadd.f32 1.0, %v699_v29 }
 0x128   : > { %v370_v31 = vmul.f32 0.5, %v369_v30 }
 0x12a   : > { %v371_v32 = vmul.f32 %v370_v31, %v358_v20 }
 0x12c   : > { %v372_v33 = vpack.c.bf16 %v371_v32, %v371_v32 }
 0x12e   : > { %646 = vmatmul.mubr.bf16.vlgmr.msra.gmra.mxu1 %v372_v33 }
 0x1ee   : > { %v478_v35 = vpop.f32.mrf.mxu1 }
 0x1ef   : > { %v479_v36 = vadd.f32 %v580_v34, %v478_v35 }
 0x1f0   : > { %v647_v37 = vpop.f32.mrf.mxu1 }
 0x1f1   : > { %484 = vst [vmem:[%s249_s22] sm:$0xff] %v479_v36 }
 0x1f2   : > { %v481_v38 = vpop.f32.mrf.mxu1 }
 0x1f4   : > { %v648_v39 = vpop.f32.mrf.mxu1 }
 0x1f5 PF: > { %s17_s18 = sadd.s32 1, %s766_s18  }
 0x1f6   : > { %p14_p3 = scmp.ge.s32.totalorder %s17_s18, 4  }
 0x1f8   :  { %16 = sbr.rel (!%p14_p3) target bundleno = 2 (0x2), region = 79 }
 0x1fd   :  { %504 = vsyncpa [#allocation3], 1 }
 0x1fe   :  { %506 = vsyncpa [#allocation3 + $0x1], 1 }
 0x1ff   :  { %507 = vsyncpa [#allocation5], 1 }

</bundles_post_ra>
